<compile_context>
chip_gen: v5e
topology: v5e:2x2
jax: 0.10.0
libtpu: 0.0.40
codegen_flags: <defaults>
</compile_context>

<pallas_src>
import functools
import math

import numpy as np
import jax
import jax.numpy as jnp
from jax import lax
from jax.experimental import pallas as pl
from jax.experimental.pallas import tpu as pltpu


def _segmented_max_kernel(bounds, x_ref, o_ref):
    """x_ref: (TP, S, TQ); o_ref: (num_seg, TP, TQ); bounds: static ((s0, s1), ...)."""
    for g, (s0, s1) in enumerate(bounds):
        # Static window: every S-row is loaded exactly once across all segments and the
        # only compute is the max-reduce itself (HBM-bound), stored lane-dense.
        o_ref[g] = jnp.max(x_ref[:, s0:s1, :], axis=1)


def _vmem_capacity_bytes():
    try:
        return int(pltpu.get_tpu_info().vmem_capacity_bytes)
    except Exception:
        return 64 * 1024 * 1024  # conservative fallback (v7x per-TensorCore VMEM)


def _pick_tiles(P, S, Q, num_seg, itemsize, budget_bytes):
    """Pick (TP, TQ) block sizes for the (P, S, Q) layout.

    TP granularity is dtype-aware (8 sublanes x 32-bit packing: 8/16/32 for
    f32/bf16/int8) so the (num_seg, TP, TQ) output block packs vregs densely; TQ is a
    multiple of 128 (unmasked lane-dense stores) unless Q has no such divisor.  The
    budget covers BOTH double-buffered blocks: 2*TP*S*TQ (input) + 2*num_seg*TP*TQ
    (output) elements.  If the best choice is a single grid step, split P (sublane
    axis) before TQ (lane axis) so both v7x TensorCores get work without narrowing
    the stores.
    """
    sub = 8 * max(1, 4 // itemsize)
    p_divs = [t for t in range(sub, P + 1, sub) if P % t == 0] or [P]
    q_divs = [t for t in range(128, Q + 1, 128) if Q % t == 0] or [Q]

    def footprint(tp, tq):
        return (2 * tp * S * tq + 2 * num_seg * tp * tq) * itemsize

    best = (p_divs[0], q_divs[0])
    for tp in p_divs:
        for tq in q_divs:
            if footprint(tp, tq) <= budget_bytes and tp * tq > best[0] * best[1]:
                best = (tp, tq)
    tp, tq = best
    if P // tp == 1 and Q // tq == 1:          # force >= 2 grid steps when possible
        if len(p_divs) > 1:
            tp = p_divs[-2]                    # prefer splitting sublanes (keep wide vst)
        elif len(q_divs) > 1:
            tq = q_divs[-2]
    return tp, tq


@functools.partial(jax.jit, static_argnames=("bounds", "dim"))
def _packed_temporal_max(seqs, *, bounds, dim):
    shape = seqs.shape
    assert 1 <= dim < len(shape), "pooled dim must be >= 1 (results are cat'ed on dim 0)"
    lead, S, tail = shape[:dim], shape[dim], shape[dim + 1:]
    P = math.prod(lead) if lead else 1
    Q = math.prod(tail) if tail else 1
    num_seg = len(bounds)
    itemsize = seqs.dtype.itemsize

    # Contiguous-merge reshape only (no transpose): (P, S, Q), Q on the lane axis.
    x3d = seqs.reshape(P, S, Q)

    vmem_cap = _vmem_capacity_bytes()
    budget = min(vmem_cap // 3, 32 * 1024 * 1024)        # generation-aware all-in cap
    TP, TQ = _pick_tiles(P, S, Q, num_seg, itemsize, budget)
    fp = (2 * TP * S * TQ + 2 * num_seg * TP * TQ) * itemsize
    vmem_limit = int(min(vmem_cap // 2, max(2 * fp, 24 * 1024 * 1024)))

    grid = (P // TP, Q // TQ)
    kernel = functools.partial(_segmented_max_kernel, bounds)

    out3d = pl.pallas_call(
        kernel,
        out_shape=jax.ShapeDtypeStruct((num_seg, P, Q), seqs.dtype),
        grid=grid,
        in_specs=[pl.BlockSpec((TP, S, TQ), lambda i, j: (i, 0, j))],
        out_specs=pl.BlockSpec((num_seg, TP, TQ), lambda i, j: (0, i, j)),
        compiler_params=pltpu.CompilerParams(
            dimension_semantics=("parallel", "parallel"),
            vmem_limit_bytes=vmem_limit),
    )(x3d)

    # (num_seg, P, Q) -> per-segment pooled shape, then torch.cat along dim 0.
    out = out3d.reshape((num_seg,) + lead + tail)
    return out.reshape((num_seg * lead[0],) + lead[1:] + tail)


def pack_sequence_wrapper_forward(seqs, seqL, dim=2):
    """Equivalent of PackSequenceWrapper(torch.max).forward(seqs, seqL, dim)[0] (values)."""
    S = int(seqs.shape[dim])
    if seqL is None:
        lens = [S]
    else:
        sl = np.asarray(seqL)
        if sl.ndim > 1:
            sl = sl[0]                 # mirrors `seqL = seqL[0]...` in the torch module
        lens = [int(v) for v in np.reshape(sl, (-1,)).tolist()]

    starts = [0] + [int(v) for v in np.cumsum(lens)[:-1]]
    bounds = []
    for st, ln in zip(starts, lens):
        if ln <= 0:
            raise ValueError("PackSequenceWrapper: empty segment "
                             "(torch.max over an empty dim would raise)")
        if st + ln > S:
            raise ValueError("PackSequenceWrapper: segment exceeds seqs.shape[dim] "
                             "(torch.narrow would raise)")
        bounds.append((st, st + ln))
    # Frames past sum(seqL) are silently ignored, exactly like the torch module.
    return _packed_temporal_max(seqs, bounds=tuple(bounds), dim=dim)


if __name__ == "__main__":
    key = jax.random.PRNGKey(0)
    n, c, s, h, w = 2, 4, 16, 16, 16
    seqs = jax.random.normal(key, (n, c, s, h, w), jnp.float32)
    # torch usage: seqL has shape [1, num_seg]; the module reads seqL[0].
    seqL = jnp.array([[10, 6]], jnp.int32)
    dim = 2

    out = jax.block_until_ready(pack_sequence_wrapper_forward(seqs, seqL, dim=dim))

    # Reference (host-known lengths, like the torch module's .cpu().numpy() pull).
    refs = []
    for st, ln in ((0, 10), (10, 6)):
        refs.append(jnp.max(lax.slice_in_dim(seqs, st, st + ln, axis=dim), axis=dim))
    ref = jnp.concatenate(refs, axis=0)
    assert out.shape == ref.shape == (2 * n, c, h, w)
    assert jnp.allclose(out, ref)

    # seqL=None path: plain max over the whole sequence axis.
    out_none = jax.block_until_ready(pack_sequence_wrapper_forward(seqs, None, dim=dim))
    assert out_none.shape == (n, c, h, w)
    assert jnp.allclose(out_none, jnp.max(seqs, axis=dim))

    print("KERNEL_OK")
</pallas_src>

<mosaic_0001>
module attributes {stable_mosaic.version = 11 : i64} {
  func.func @_segmented_max_kernel(%arg0: i32, %arg1: i32, %arg2: memref<8x16x128xf32, #tpu.memory_space<vmem>>, %arg3: memref<2x8x128xf32, #tpu.memory_space<vmem>>) attributes {dimension_semantics = [#tpu.dimension_semantics<parallel>, #tpu.dimension_semantics<parallel>], iteration_bounds = array<i64: 1, 2>, scalar_prefetch = 0 : i64, scratch_operands = 0 : i64, tpu.core_type = #tpu.core_type<tc>, window_params = [{transform_indices = @transform_0, window_bounds = array<i64: 8, 16, 128>}, {transform_indices = @transform_1, window_bounds = array<i64: 2, 8, 128>}]} {
    %c0 = arith.constant 0 : index
    %c0_0 = arith.constant 0 : index
    %c0_1 = arith.constant 0 : index
    %0 = vector.load %arg2[%c0, %c0_0, %c0_1] : memref<8x16x128xf32, #tpu.memory_space<vmem>>, vector<8x10x128xf32>
    %cst = arith.constant dense<0xFF800000> : vector<8x128xf32>
    %1 = vector.multi_reduction <maximumf>, %0, %cst [1] : vector<8x10x128xf32> to vector<8x128xf32>
    %c0_2 = arith.constant 0 : index
    %c0_3 = arith.constant 0 : index
    %c0_4 = arith.constant 0 : index
    %2 = vector.load %arg3[%c0_2, %c0_3, %c0_4] : memref<2x8x128xf32, #tpu.memory_space<vmem>>, vector<1x8x128xf32>
    %3 = vector.shape_cast %2 : vector<1x8x128xf32> to vector<8x128xf32>
    %4 = vector.shape_cast %1 : vector<8x128xf32> to vector<1x8x128xf32>
    tpu.vector_store %arg3[%c0_2, %c0_3, %c0_4], %4 {strides = array<i32>} : memref<2x8x128xf32, #tpu.memory_space<vmem>>, vector<1x8x128xf32>,
    %c0_5 = arith.constant 0 : index
    %c10 = arith.constant 10 : index
    %c0_6 = arith.constant 0 : index
    %5 = vector.load %arg2[%c0_5, %c10, %c0_6] : memref<8x16x128xf32, #tpu.memory_space<vmem>>, vector<8x6x128xf32>
    %cst_7 = arith.constant dense<0xFF800000> : vector<8x128xf32>
    %6 = vector.multi_reduction <maximumf>, %5, %cst_7 [1] : vector<8x6x128xf32> to vector<8x128xf32>
    %c1 = arith.constant 1 : index
    %c0_8 = arith.constant 0 : index
    %c0_9 = arith.constant 0 : index
    %7 = vector.load %arg3[%c1, %c0_8, %c0_9] : memref<2x8x128xf32, #tpu.memory_space<vmem>>, vector<1x8x128xf32>
    %8 = vector.shape_cast %7 : vector<1x8x128xf32> to vector<8x128xf32>
    %9 = vector.shape_cast %6 : vector<8x128xf32> to vector<1x8x128xf32>
    tpu.vector_store %arg3[%c1, %c0_8, %c0_9], %9 {strides = array<i32>} : memref<2x8x128xf32, #tpu.memory_space<vmem>>, vector<1x8x128xf32>,
    return
  }
  func.func @transform_0(%arg0: i32, %arg1: i32) -> (i32, i32, i32) {
    %c0_i32 = arith.constant 0 : i32
    %c0_i32_0 = arith.constant 0 : i32
    return %arg0, %c0_i32, %arg1 : i32, i32, i32
  }
  func.func @transform_1(%arg0: i32, %arg1: i32) -> (i32, i32, i32) {
    %c0_i32 = arith.constant 0 : i32
    %c0_i32_0 = arith.constant 0 : i32
    return %c0_i32, %arg0, %arg1 : i32, i32, i32
  }
}

</mosaic_0001>

<bundles_post_ra>
// kernel: _packed_temporal_max.1
= control target key start
LH: loop header
LB: loop body
LE: loop exit
PB: predicated region body
PF: predicated region fallthrough
CT: control target
= control target key end

     0   :  { %s635_s6 = smov 0   ;;  %s637_s7 = smov 0   ;;  %s791_s0 = inlined_call_operand.vmem [shape: f32[8,16,256], index: 0, kind: input, shape index: {}]   ;;  %s792_s1 = inlined_call_operand.vmem [shape: f32[2,8,256], index: 1, kind: output, shape index: {}]  }
   0x1   :  { %s639_s8 = smov 0   ;;  %s641_s9 = smov 0  }
   0x2   :  { %s643_s10 = smov 0  }
   0x3 LB: > { %s20_s11 = sadd.s32 1, %s619_s9  ;;  %s531_s12 = sadd.s32 4294967295, %s623_s10   ;;  %s623_s10 = sphi %s643_s10, %s11_s10   ;;  %s619_s9 = sphi %s641_s9, %s797_s9   ;;  %s615_s8 = sphi %s639_s8, %s796_s8   ;;  %s611_s7 = sphi %s637_s7, %s795_s7   ;;  %s607_s6 = sphi %s635_s6, %s794_s6  }
   0x4   : > { %p21_p0 = scmp.ge.s32.totalorder %s20_s11, 2  ;;  %p39_p1 = scmp.ne.s32.totalorder %s611_s7, %s607_s6 }
   0x5   : > { %p40_p2 = scmp.eq.s32.totalorder %s623_s10, 0  ;;  %p71_p4 = scmp.eq.s32.totalorder %s531_s12, 1 }
   0x6   : > { %s799_s11 = smov (%p21_p0, %s20_s11), 0  ;;  %s32_s14 = sadd.s32 1, %s611_s7 }
   0x7   : > { %p41_p3 = por %p40_p2, %p39_p1  ;;  %s28_s13 = ssub.s32 %s619_s9, %s799_s11 }
   0x8   : > { %p30_p5 = scmp.eq.s32.totalorder %s28_s13, 0  ;;  %p670_p6 = por %p71_p4, %p39_p1 }
   0x9   : > { %p534_p7 = scmp.ge.s32.totalorder %s623_s10, 2 }
   0xa   : > { %s675_s16 = scalar_select %p30_p5, %s611_s7, %s32_s14  }
   0xb   : > { %93 = sbr.rel (%p534_p7) target bundleno = 36 (0x24), region = 16 }
  0x10   : > { %96 = sbr.rel (!%p41_p3) target bundleno = 36 (0x24), region = 20  ;;  %s98_s17 = sand.u32 (%p41_p3), 1, %s611_s7  }
  0x11   : > { %s536_s18 = sshll.u32 (%p41_p3), %s619_s9, 3  ;;  %s535_s19 = sshll.u32 (%p41_p3), %s98_s17, 7 }
  0x12   : > { %s683_s22 = scalar_lea.vmem (%p41_p3), %s791_s0, %s536_s18  ;;  %s100_s23 = scalar_lea.vmem (%p41_p3), [#allocation2], %s535_s19 }
  0x13   : > { %v164_v0 = vld [vmem:[%s683_s22] sm:$0xff] (%p41_p3)  ;;  %v166_v1 = vld [vmem:[%s683_s22 + $0x10] sm:$0xff] (%p41_p3) }
  0x14   : > { %v168_v2 = vld [vmem:[%s683_s22 + $0x20] sm:$0xff] (%p41_p3)  ;;  %165 = vst [vmem:[%s100_s23] sm:$0xff] (%p41_p3), %v164_v0  ;;  %v170_v3 = vld [vmem:[%s683_s22 + $0x30] sm:$0xff] (%p41_p3) }
  0x15   : > { %167 = vst [vmem:[%s100_s23 + $0x8] sm:$0xff] %v166_v1  ;;  %v172_v4 = vld [vmem:[%s683_s22 + $0x40] sm:$0xff]  ;;  %v174_v5 = vld [vmem:[%s683_s22 + $0x50] sm:$0xff] }
  0x16   : > { %169 = vst [vmem:[%s100_s23 + $0x10] sm:$0xff] %v168_v2  ;;  %v176_v6 = vld [vmem:[%s683_s22 + $0x60] sm:$0xff]  ;;  %v178_v7 = vld [vmem:[%s683_s22 + $0x70] sm:$0xff] }
  0x17   : > { %171 = vst [vmem:[%s100_s23 + $0x18] sm:$0xff] %v170_v3  ;;  %v180_v8 = vld [vmem:[%s683_s22 + $0x80] sm:$0xff]  ;;  %v182_v9 = vld [vmem:[%s683_s22 + $0x90] sm:$0xff] }
  0x18   : > { %173 = vst [vmem:[%s100_s23 + $0x20] sm:$0xff] %v172_v4  ;;  %v184_v10 = vld [vmem:[%s683_s22 + $0xa0] sm:$0xff]  ;;  %v186_v11 = vld [vmem:[%s683_s22 + $0xb0] sm:$0xff] }
  0x19   : > { %175 = vst [vmem:[%s100_s23 + $0x28] sm:$0xff] %v174_v5  ;;  %v188_v12 = vld [vmem:[%s683_s22 + $0xc0] sm:$0xff]  ;;  %v190_v13 = vld [vmem:[%s683_s22 + $0xd0] sm:$0xff] }
  0x1a   : > { %177 = vst [vmem:[%s100_s23 + $0x30] sm:$0xff] %v176_v6  ;;  %v192_v14 = vld [vmem:[%s683_s22 + $0xe0] sm:$0xff]  ;;  %v194_v15 = vld [vmem:[%s683_s22 + $0xf0] sm:$0xff] }
  0x1b   : > { %179 = vst [vmem:[%s100_s23 + $0x38] sm:$0xff] %v178_v7 }
  0x1c   : > { %181 = vst [vmem:[%s100_s23 + $0x40] sm:$0xff] %v180_v8 }
  0x1d   : > { %183 = vst [vmem:[%s100_s23 + $0x48] sm:$0xff] %v182_v9 }
  0x1e   : > { %185 = vst [vmem:[%s100_s23 + $0x50] sm:$0xff] %v184_v10 }
  0x1f   : > { %187 = vst [vmem:[%s100_s23 + $0x58] sm:$0xff] %v186_v11 }
  0x20   : > { %189 = vst [vmem:[%s100_s23 + $0x60] sm:$0xff] %v188_v12 }
  0x21   : > { %191 = vst [vmem:[%s100_s23 + $0x68] sm:$0xff] %v190_v13 }
  0x22   : > { %193 = vst [vmem:[%s100_s23 + $0x70] sm:$0xff] %v192_v14 }
  0x23   : > { %195 = vst [vmem:[%s100_s23 + $0x78] sm:$0xff] %v194_v15 }
  0x24 PF: > { %p537_p8 = scmp.ge.s32.totalorder %s623_s10, 1  ;;  %p200_p9 = scmp.lt.s32.totalorder %s623_s10, 3 }
  0x26   : > { %p201_p10 = pnand %p537_p8, %p200_p9 }
  0x27   : > { %s207_s24 = sand.u32 (!%p201_p10), 1, %s607_s6  }
  0x28   : > { %204 = sbr.rel (%p201_p10) target bundleno = 97 (0x61), region = 58  ;;  %s538_s25 = sshll.u32 (!%p201_p10), %s207_s24, 7 }
  0x29   : > { %s706_s26 = scalar_lea.vmem (!%p201_p10), [#allocation2], %s538_s25  ;;  %s539_s27 = sshll.u32 (!%p201_p10), %s207_s24, 4 }
  0x2a   : > { %s756_s28 = scalar_lea.vmem (!%p201_p10), [#allocation3], %s539_s27 }
  0x2d   : > { %vm242_vm0 = vcmask 1041408   ;;  %v226_v16 = vld [vmem:[%s706_s26] sm:$0xff]  ;;  %v227_v17 = vld [vmem:[%s706_s26 + $0x8] sm:$0x3]  ;;  %v228_v18 = vld [vmem:[%s706_s26 + $0x10] sm:$0xff]  ;;  %vm339_vm1 = vcmask 1045504  }
  0x2e   : > { %v229_v19 = vld [vmem:[%s706_s26 + $0x18] sm:$0x3]  ;;  %v230_v20 = vld [vmem:[%s706_s26 + $0x20] sm:$0xff]  ;;  %v231_v21 = vld [vmem:[%s706_s26 + $0x28] sm:$0x3]  ;;  %v243_v22 = vsel %vm242_vm0, %v227_v17, -inf }
  0x2f   : > { %v232_v23 = vld [vmem:[%s706_s26 + $0x30] sm:$0xff]  ;;  %v233_v24 = vld [vmem:[%s706_s26 + $0x38] sm:$0x3]  ;;  %v234_v25 = vld [vmem:[%s706_s26 + $0x40] sm:$0xff]  ;;  %v244_v26 = vmax.f32 %v226_v16, %v243_v22  ;;  %v251_v27 = vsel %vm242_vm0, %v229_v19, -inf  ;;  %v259_v28 = vsel %vm242_vm0, %v231_v21, -inf }
  0x30   : > { %v235_v29 = vld [vmem:[%s706_s26 + $0x48] sm:$0x3]  ;;  %v236_v30 = vld [vmem:[%s706_s26 + $0x50] sm:$0xff]  ;;  %v237_v31 = vld [vmem:[%s706_s26 + $0x58] sm:$0x3]  ;;  %v252_v32 = vmax.f32 %v228_v18, %v251_v27  ;;  %v260_v33 = vmax.f32 %v230_v20, %v259_v28  ;;  %v267_v34 = vsel %vm242_vm0, %v233_v24, -inf }
  0x31   : > { %v238_v35 = vld [vmem:[%s706_s26 + $0x60] sm:$0xff]  ;;  %v239_v36 = vld [vmem:[%s706_s26 + $0x68] sm:$0x3]  ;;  %v245_v37 = vrot.slane %v244_v26, 4  ;;  %v268_v38 = vmax.f32 %v232_v23, %v267_v34  ;;  %v275_v39 = vsel %vm242_vm0, %v235_v29, -inf  ;;  %v283_v44 = vsel %vm242_vm0, %v237_v31, -inf }
  0x32   : > { %v241_v40 = vld [vmem:[%s706_s26 + $0x78] sm:$0x3]  ;;  %v253_v41 = vrot.slane %v252_v32, 4  ;;  %v261_v42 = vrot.slane %v260_v33, 4  ;;  %v276_v43 = vmax.f32 %v234_v25, %v275_v39  ;;  %v284_v47 = vmax.f32 %v236_v30, %v283_v44  ;;  %v240_v49 = vld [vmem:[%s706_s26 + $0x70] sm:$0xff]  ;;  %s542_s29 = sshll.u32 (%p670_p6), %s615_s8, 3 }
  0x33   : > { %v246_v45 = vmax.f32 %v244_v26, %v245_v37  ;;  %v269_v46 = vrot.slane %v268_v38, 4  ;;  %v291_v48 = vsel %vm242_vm0, %v239_v36, -inf  ;;  %vm315_vm2 = vcmask 1041409   ;;  %v331_v14 = vld [vmem:[%s706_s26 + $0xa] sm:$0x3f]  ;;  %s424_s3 = scalar_lea.vmem (%p670_p6), %s792_s1, %s542_s29 }
  0x34   : > { %v254_v50 = vmax.f32 %v252_v32, %v253_v41  ;;  %v262_v51 = vmax.f32 %v260_v33, %v261_v42  ;;  %v277_v52 = vrot.slane %v276_v43, 4  ;;  %v292_v53 = vmax.f32 %v238_v35, %v291_v48  ;;  %v332_v23 = vld [vmem:[%s706_s26 + $0x1a] sm:$0x3f]  ;;  %v333_v31 = vld [vmem:[%s706_s26 + $0x2a] sm:$0x3f] }
  0x35   : > { %vm317_vm3 = vcmask 1042434   ;;  %v247_v54 = vrot.slane %v246_v45, 2  ;;  %v270_v55 = vmax.f32 %v268_v38, %v269_v46  ;;  %v285_v56 = vrot.slane %v284_v47, 4  ;;  %v334_v32 = vld [vmem:[%s706_s26 + $0x3a] sm:$0x3f] }
  0x36   : > { %v299_v57 = vsel %vm242_vm0, %v241_v40, -inf  ;;  %vm319_vm4 = vcmask 1043459   ;;  %v255_v58 = vrot.slane %v254_v50, 2  ;;  %v263_v59 = vrot.slane %v262_v51, 2  ;;  %v335_v40 = vld [vmem:[%s706_s26 + $0x4a] sm:$0x3f] }
  0x37   : > { %v278_v60 = vmax.f32 %v276_v43, %v277_v52  ;;  %v293_v61 = vrot.slane %v292_v53, 4  ;;  %vm321_vm5 = vcmask 1044484   ;;  %v248_v62 = vmax.f32 %v246_v45, %v247_v54  ;;  %v336_v48 = vld [vmem:[%s706_s26 + $0x5a] sm:$0x3f] }
  0x38   : > { %v271_v63 = vrot.slane %v270_v55, 2  ;;  %v286_v0 = vmax.f32 %v284_v47, %v285_v56  ;;  %v300_v1 = vmax.f32 %v240_v49, %v299_v57  ;;  %vm323_vm6 = vcmask 1045509   ;;  %v337_v49 = vld [vmem:[%s706_s26 + $0x6a] sm:$0x3f]  ;;  %v338_v57 = vld [vmem:[%s706_s26 + $0x7a] sm:$0x3f] }
  0x39   : > { %v256_v2 = vmax.f32 %v254_v50, %v255_v58  ;;  %v264_v3 = vmax.f32 %v262_v51, %v263_v59  ;;  %v279_v4 = vrot.slane %v278_v60, 2  ;;  %v294_v5 = vmax.f32 %v292_v53, %v293_v61 }
  0x3a   : > { %vm325_vm7 = vcmask 1046534   ;;  %v249_v6 = vrot.slane %v248_v62, 1  ;;  %v272_v7 = vmax.f32 %v270_v55, %v271_v63  ;;  %v287_v8 = vrot.slane %v286_v0, 2 }
  0x3b   : > { %v301_v9 = vrot.slane %v300_v1, 4  ;;  %v257_v10 = vrot.slane %v256_v2, 1  ;;  %v265_v11 = vrot.slane %v264_v3, 1  ;;  %v280_v12 = vmax.f32 %v278_v60, %v279_v4 }
  0x3c   : > { %v295_v13 = vrot.slane %v294_v5, 2  ;;  %vm327_vm8 = vcmask 1047559   ;;  %v250_v15 = vmax.f32 %v248_v62, %v249_v6  ;;  %v273_v16 = vrot.slane %v272_v7, 1 }
  0x3d   : > { %v288_v17 = vmax.f32 %v286_v0, %v287_v8  ;;  %v302_v18 = vmax.f32 %v300_v1, %v301_v9  ;;  %v258_v19 = vmax.f32 %v256_v2, %v257_v10  ;;  %v266_v20 = vmax.f32 %v264_v3, %v265_v11 }
  0x3e   : > { %v281_v21 = vrot.slane %v280_v12, 1  ;;  %v296_v22 = vmax.f32 %v294_v5, %v295_v13  ;;  %v274_v24 = vmax.f32 %v272_v7, %v273_v16  ;;  %v340_v27 = vsel %vm339_vm1, %v331_v14, -inf }
  0x3f   : > { %v289_v25 = vrot.slane %v288_v17, 1  ;;  %v303_v26 = vrot.slane %v302_v18, 2  ;;  %v316_v30 = vsel %vm315_vm2, %v258_v19, %v250_v15  ;;  %v341_v33 = vrot.slane %v340_v27, 4 }
  0x40   : > { %v282_v28 = vmax.f32 %v280_v12, %v281_v21  ;;  %v297_v29 = vrot.slane %v296_v22, 1  ;;  %v318_v36 = vsel %vm317_vm3, %v266_v20, %v316_v30  ;;  %v347_v37 = vsel %vm339_vm1, %v332_v23, -inf }
  0x41   : > { %v290_v34 = vmax.f32 %v288_v17, %v289_v25  ;;  %v304_v35 = vmax.f32 %v302_v18, %v303_v26  ;;  %v320_v39 = vsel %vm319_vm4, %v274_v24, %v318_v36  ;;  %v342_v41 = vmax.f32 %v340_v27, %v341_v33 }
  0x42   : > { %v298_v38 = vmax.f32 %v296_v22, %v297_v29  ;;  %v348_v42 = vrot.slane %v347_v37, 4  ;;  %v322_v44 = vsel %vm321_vm5, %v282_v28, %v320_v39  ;;  %v354_v45 = vsel %vm339_vm1, %v333_v31, -inf }
  0x43   : > { %v305_v43 = vrot.slane %v304_v35, 1  ;;  %v361_v46 = vsel %vm339_vm1, %v334_v32, -inf  ;;  %v324_v47 = vsel %vm323_vm6, %v290_v34, %v322_v44  ;;  %v343_v50 = vrot.slane %v342_v41, 2 }
  0x44   : > { %v349_v51 = vmax.f32 %v347_v37, %v348_v42  ;;  %v355_v52 = vrot.slane %v354_v45, 4  ;;  %v326_v54 = vsel %vm325_vm7, %v298_v38, %v324_v47  ;;  %v362_v55 = vrot.slane %v361_v46, 4 }
  0x45   : > { %v306_v53 = vmax.f32 %v304_v35, %v305_v43  ;;  %v368_v56 = vsel %vm339_vm1, %v335_v40, -inf  ;;  %v344_v58 = vmax.f32 %v342_v41, %v343_v50  ;;  %v375_v0 = vsel %vm339_vm1, %v336_v48, -inf }
  0x46   : > { %v350_v59 = vrot.slane %v349_v51, 2  ;;  %v356_v60 = vmax.f32 %v354_v45, %v355_v52  ;;  %v369_v61 = vrot.slane %v368_v56, 4  ;;  %v363_v63 = vmax.f32 %v361_v46, %v362_v55 }
  0x47   : > { %v328_v62 = vsel %vm327_vm8, %v306_v53, %v326_v54  ;;  %v382_v1 = vsel %vm339_vm1, %v337_v49, -inf  ;;  %v345_v2 = vrot.slane %v344_v58, 1  ;;  %v376_v7 = vrot.slane %v375_v0, 4 }
  0x48   : > { %330 = vst [vmem:[%s756_s28] sm:$0xff] %v328_v62  ;;  %v351_v3 = vmax.f32 %v349_v51, %v350_v59  ;;  %v357_v4 = vrot.slane %v356_v60, 2  ;;  %v370_v5 = vmax.f32 %v368_v56, %v369_v61  ;;  %v364_v6 = vrot.slane %v363_v63, 2 }
  0x49   : > { %v383_v8 = vrot.slane %v382_v1, 4  ;;  %v389_v9 = vsel %vm339_vm1, %v338_v57, -inf  ;;  %v346_v10 = vmax.f32 %v344_v58, %v345_v2  ;;  %v377_v15 = vmax.f32 %v375_v0, %v376_v7 }
  0x4a   : > { %v352_v11 = vrot.slane %v351_v3, 1  ;;  %v358_v12 = vmax.f32 %v356_v60, %v357_v4  ;;  %v371_v13 = vrot.slane %v370_v5, 2  ;;  %v365_v14 = vmax.f32 %v363_v63, %v364_v6 }
  0x4b   : > { %v384_v16 = vmax.f32 %v382_v1, %v383_v8  ;;  %v390_v17 = vrot.slane %v389_v9, 4  ;;  %v378_v22 = vrot.slane %v377_v15, 2 }
  0x4c   : > { %v353_v18 = vmax.f32 %v351_v3, %v352_v11  ;;  %v359_v19 = vrot.slane %v358_v12, 1  ;;  %v372_v20 = vmax.f32 %v370_v5, %v371_v13  ;;  %v366_v21 = vrot.slane %v365_v14, 1 }
  0x4d   : > { %v385_v23 = vrot.slane %v384_v16, 2  ;;  %v391_v24 = vmax.f32 %v389_v9, %v390_v17  ;;  %v379_v29 = vmax.f32 %v377_v15, %v378_v22 }
  0x4e   : > { %v360_v25 = vmax.f32 %v358_v12, %v359_v19  ;;  %v373_v26 = vrot.slane %v372_v20, 1  ;;  %v404_v27 = vsel %vm315_vm2, %v353_v18, %v346_v10  ;;  %v367_v28 = vmax.f32 %v365_v14, %v366_v21 }
  0x4f   : > { %v386_v30 = vmax.f32 %v384_v16, %v385_v23  ;;  %v392_v31 = vrot.slane %v391_v24, 2  ;;  %v380_v34 = vrot.slane %v379_v29, 1  ;;  %v455_v46 = vld [vmem:[%s756_s28] sm:$0xff] (%p670_p6) }
  0x50   : > { %v374_v32 = vmax.f32 %v372_v20, %v373_v26  ;;  %v405_v33 = vsel %vm317_vm3, %v360_v25, %v404_v27  ;;  %456 = vst [vmem:[%s424_s3] sm:$0xff] (%p670_p6), %v455_v46 }
  0x51   : > { %v387_v35 = vrot.slane %v386_v30, 1  ;;  %v393_v36 = vmax.f32 %v391_v24, %v392_v31  ;;  %v406_v37 = vsel %vm319_vm4, %v367_v28, %v405_v33  ;;  %v381_v39 = vmax.f32 %v379_v29, %v380_v34 }
  0x52   : > { %v407_v38 = vsel %vm321_vm5, %v374_v32, %v406_v37 }
  0x53   : > { %v388_v40 = vmax.f32 %v386_v30, %v387_v35  ;;  %v394_v41 = vrot.slane %v393_v36, 1  ;;  %v408_v43 = vsel %vm323_vm6, %v381_v39, %v407_v38 }
  0x54   : > { %420 = sbr.rel (!%p670_p6) target bundleno = 97 (0x61), region = 66 }
  0x55   : > { %v395_v42 = vmax.f32 %v393_v36, %v394_v41  ;;  %v409_v44 = vsel %vm325_vm7, %v388_v40, %v408_v43 }
  0x57   : > { %v410_v45 = vsel %vm327_vm8, %v395_v42, %v409_v44 }
  0x58   : > { %540 = vst [vmem:[%s756_s28 + $0x8] sm:$0xff] %v410_v45 }
  0x5f   : > { %v457_v47 = vld [vmem:[%s756_s28 + $0x8] sm:$0xff] }
  0x60   : > { %458 = vst [vmem:[%s424_s3 + $0x10] sm:$0xff] %v457_v47 }
  0x61 PF: > { %s11_s10 = sadd.s32 1, %s623_s10   ;;  %s794_s6 = smov %s611_s7 }
  0x62   : > { %p8_p11 = scmp.ge.s32.totalorder %s11_s10, 4   ;;  %s795_s7 = smov %s675_s16 }
  0x63   : > { %s796_s8 = smov %s619_s9  ;;  %s797_s9 = smov %s799_s11 }
  0x64   :  { %10 = sbr.rel (!%p8_p11) target bundleno = 3 (0x3), region = 136 }

</bundles_post_ra>
